<compile_context>
chip_gen: v7x
topology: tpu7x:2x2x1
jax: 0.10.0
libtpu: 0.0.40
codegen_flags: <defaults>
</compile_context>

<pallas_src>
import functools
import numpy as np
import jax
import jax.numpy as jnp
from jax.experimental import pallas as pl
from jax.experimental.pallas import tpu as pltpu

DIM_IN = 4
HIDDEN = [32, 32]
ACTIVATION = "tanh"
N_L = DIM_IN * (DIM_IN + 1) // 2 - DIM_IN          # strict lower-triangular entries
N_M = DIM_IN * (DIM_IN + 1) // 2                   # lower-triangular (incl. diag)
DIM_OUT = 2 * DIM_IN + N_L + N_M                   # MLP output width (= 24 for d=4)


def _round_up(a, m):
    return (a + m - 1) // m * m


def _act(x, name):
    if name == "linear":
        return x
    if name == "sigmoid":
        return jax.nn.sigmoid(x)
    if name == "relu":
        return jnp.maximum(x, 0.0)
    if name == "tanh":
        return jnp.tanh(x)
    if name == "sin":
        return jnp.sin(x)
    if name == "elu":
        # clamp before exp so huge positive inputs never generate inf on the dead branch
        return jnp.where(x > 0, x, jnp.exp(jnp.minimum(x, 0.0)) - 1.0)
    # TODO(synk): 'rrelu' (randomized leaky relu) is stochastic at train time; no
    # deterministic Pallas equivalent is implemented here.
    raise NotImplementedError(name)


@functools.lru_cache(maxsize=None)
def build_structure_constants(d):
    """Param-independent structure matrices (numpy, built once per d).

    Returns:
      fuse_lm : (2*dd, dim_out)  MLP-output -> [Lflat (skew) ; Mflat (lower-tri)]
      expall  : (4*dd, 2*d)      rows 0:2dd  [a;b]   -> [emod@a ; emod@b]   (v[k%d])
                                 rows 2dd:   [dE;dS] -> [ediv@dS ; ediv@dE] (v[k//d])
      rmod2   : (2*d, 2*dd)      [u;v] -> [rmod@u ; rmod@v]   (A^T @ vec reductions)
      dmask   : (dd, 1)          1.0 on flattened diagonal entries of M
      rout_c, rout_dt : (16, 3*dd+2*d)  packed-output matrix; ROUT = rout_c + dt*rout_dt
    """
    nL = d * (d + 1) // 2 - d
    nM = d * (d + 1) // 2
    dim_out = 2 * d + nL + nM
    dd = d * d

    fuse_lm = np.zeros((2 * dd, dim_out), np.float32)
    for t, (i, j) in enumerate(zip(*np.tril_indices(d, -1))):
        fuse_lm[i * d + j, 2 * d + t] = 1.0
        fuse_lm[j * d + i, 2 * d + t] = -1.0
    for t, (i, j) in enumerate(zip(*np.tril_indices(d, 0))):
        fuse_lm[dd + i * d + j, 2 * d + nL + t] = 1.0

    emod = np.zeros((dd, d), np.float32)   # v -> v[k %  d]
    ediv = np.zeros((dd, d), np.float32)   # v -> v[k // d]
    rmod = np.zeros((d, dd), np.float32)   # sum over k %  d == i  (A^T @ v)
    rdiv = np.zeros((d, dd), np.float32)   # sum over k // d == i  (A   @ v)
    for k in range(dd):
        emod[k, k % d] = 1.0
        ediv[k, k // d] = 1.0
        rmod[k % d, k] = 1.0
        rdiv[k // d, k] = 1.0

    expmod2 = np.zeros((2 * dd, 2 * d), np.float32)
    expmod2[:dd, :d] = emod
    expmod2[dd:, d:] = emod
    expdiv2 = np.zeros((2 * dd, 2 * d), np.float32)   # note the swap: [dE;dS]->[dS_div;dE_div]
    expdiv2[:dd, d:] = ediv
    expdiv2[dd:, :d] = ediv
    expall = np.concatenate([expmod2, expdiv2], axis=0)              # (4dd, 2d)

    rmod2 = np.zeros((2 * d, 2 * dd), np.float32)
    rmod2[:d, :dd] = rmod
    rmod2[d:, dd:] = rmod

    dmask = np.zeros((dd, 1), np.float32)
    dmask[np.arange(d) * (d + 1), 0] = 1.0

    # Packed-output matrix.  Output rows: [0:d]=x1, [d:2d]=degE, [2d:3d]=degS, rest 0.
    # Stacked-operand rows (cols here): [0:dd]=A1, [dd:2dd]=A2, [2dd:3dd]=A3,
    # [3dd:3dd+d]=x, [3dd+d:3dd+2d]=alignment pad (coefficients are zero).
    ncol = 3 * dd + 2 * d
    nrow = _round_up(3 * d, 8)
    rout_c = np.zeros((nrow, ncol), np.float32)
    rout_dt = np.zeros((nrow, ncol), np.float32)
    rout_dt[0:d, 0:dd] = rdiv                                # dt * (L dE + M M^T dS)
    rout_c[0:d, 3 * dd:3 * dd + d] = np.eye(d, dtype=np.float32)   # + x
    rout_c[d:2 * d, dd:2 * dd] = rdiv                        # degE = M M^T dE
    rout_c[2 * d:3 * d, 2 * dd:3 * dd] = rdiv                # degS = L dS
    return fuse_lm, expall, rmod2, dmask, rout_c, rout_dt


def spnn_kernel(x_ref, w0_ref, w1_ref, wbig_ref, ball_ref, expall_ref,
                rmod2_ref, dmask_ref, rout_ref, out_ref, *, acts, d, h_sizes, b_offs):
    f32 = jnp.float32
    dd = d * d
    n_mid = 2 * dd + 2 * d
    h0, h1 = h_sizes
    o0, o1, o2 = b_offs

    x = x_ref[...]                                                       # (d, tb)
    b0 = ball_ref[o0:o0 + h0, :]
    b1 = ball_ref[o1:o1 + h1, :]
    bbig = ball_ref[o2:o2 + n_mid, :]

    # ---- MLP hot path: W @ X + b, lane-dense on the MXU ----
    h = _act(jnp.dot(w0_ref[...], x, preferred_element_type=f32) + b0, acts[0])
    h = _act(jnp.dot(w1_ref[...], h, preferred_element_type=f32) + b1, acts[1])
    # Final linear layer + L/M selection folded into WBIG at trace time
    # (exact: the module's last activation is always 'linear').
    mid = jnp.dot(wbig_ref[...], h, preferred_element_type=f32) + bbig   # (2dd+2d, tb)

    Lflat = mid[0:dd, :]                     # skew-symmetric L, row-major flattened
    Mraw = mid[dd:2 * dd, :]                 # lower-triangular M, row-major flattened
    dEdS = mid[2 * dd:2 * dd + 2 * d, :]     # rows [0:d]=dEdz, [d:2d]=dSdz

    # abs() on the diagonal of M only: single select with a lane-broadcast mask.
    Mflat = jnp.where(dmask_ref[...] > 0.5, jnp.abs(Mraw), Mraw)

    expmod2 = expall_ref[0:2 * dd, :]        # [a;b]   -> [emod@a ; emod@b]
    expdiv2 = expall_ref[2 * dd:4 * dd, :]   # [dE;dS] -> [ediv@dS ; ediv@dE]
    rmod2 = rmod2_ref[...]                   # [u;v]   -> [rmod@u ; rmod@v]

    # M^T dS and M^T dE with one block-diagonal reduction matmul.
    div_sw = jnp.dot(expdiv2, dEdS, preferred_element_type=f32)          # [dS_div ; dE_div]
    mm = jnp.concatenate([Mflat, Mflat], axis=0) * div_sw                # [M*dS_div ; M*dE_div]
    mt_both = jnp.dot(rmod2, mm, preferred_element_type=f32)             # [M^T dS ; M^T dE]

    mod2 = jnp.dot(expmod2, dEdS, preferred_element_type=f32)            # [dE_mod ; dS_mod]
    emt = jnp.dot(expmod2, mt_both, preferred_element_type=f32)          # [e(M^T dS); e(M^T dE)]

    # Flattened integrands; one packed matmul reduces them, pre-applies dt and
    # "+ x", and yields the whole aligned (16, tb) output block in one store:
    # rows [0:d]=x1, [d:2d]=degE, [2d:3d]=degS, [3d:16]=0.
    a1 = Lflat * mod2[0:dd, :] + Mflat * emt[0:dd, :]                    # L dE + M (M^T dS)
    a2 = Mflat * emt[dd:2 * dd, :]                                       # M (M^T dE)
    a3 = Lflat * mod2[dd:2 * dd, :]                                      # L dS
    # x appears twice so the stacked operand is 56 rows (8-aligned); the second
    # copy multiplies zero columns of ROUT and is ignored.
    stacked = jnp.concatenate([a1, a2, a3, x, x], axis=0)                # (3dd+2d, tb)
    out_ref[...] = jnp.dot(rout_ref[...], stacked, preferred_element_type=f32)


def spnn_forward(x, dt, params, *, activation=ACTIVATION, batch_tile=None):
    w0, b0, w1, b1, w2, b2 = params
    B, d = x.shape
    dd = d * d
    h0, h1 = int(w0.shape[0]), int(w1.shape[0])
    n_mid = 2 * dd + 2 * d
    acts = (activation, activation, "linear")   # module always ends with 'linear'
    assert acts[2] == "linear"                  # required for the W2/b2 fold below

    fuse_lm, expall, rmod2, dmask, rout_c, rout_dt = build_structure_constants(d)

    # ---- trace-time folds (exact; HIGHEST precision so no bf16 rounding) ----
    hi = jax.lax.Precision.HIGHEST
    w2f = jnp.asarray(w2, jnp.float32)
    b2f = jnp.asarray(b2, jnp.float32).reshape(-1)
    wbig = jnp.concatenate(
        [jnp.matmul(jnp.asarray(fuse_lm), w2f, precision=hi), w2f[:2 * d]], axis=0)
    bbig = jnp.concatenate(
        [jnp.matmul(jnp.asarray(fuse_lm), b2f, precision=hi), b2f[:2 * d]], axis=0)
    rout = jnp.asarray(rout_c) + jnp.float32(dt) * jnp.asarray(rout_dt)  # dt baked in

    # All biases in one padded array (fewer tiny DMAs); 8-aligned segment offsets.
    def pad8(a):
        a = jnp.asarray(a, jnp.float32).reshape(-1, 1)
        return jnp.pad(a, ((0, _round_up(a.shape[0], 8) - a.shape[0]), (0, 0)))
    b0p, b1p, bbp = pad8(b0), pad8(b1), pad8(bbig)
    b_offs = (0, int(b0p.shape[0]), int(b0p.shape[0] + b1p.shape[0]))
    ball = jnp.concatenate([b0p, b1p, bbp], axis=0)

    # ---- batch tiling: few large steps, but >= 2 steps whenever B allows so
    # both v7x TensorCores get work; VMEM is never the limit at these sizes.
    if batch_tile is None:
        b128 = _round_up(B, 128)
        batch_tile = max(128, min(_round_up(max(b128 // 2, 1), 128), 2048))
    Bp = _round_up(B, batch_tile)

    # Transpose so batch rides the 128-lane axis; pad lanes to the tile grid.
    xT = jnp.pad(jnp.asarray(x, jnp.float32).T, ((0, 0), (0, Bp - B)))   # (d, Bp)
    w0f = jnp.asarray(w0, jnp.float32)
    w1f = jnp.asarray(w1, jnp.float32)
    expall_j = jnp.asarray(expall)
    rmod2_j = jnp.asarray(rmod2)
    dmask_j = jnp.asarray(dmask)

    nrow_out = int(rout_c.shape[0])
    ncol = int(rout_c.shape[1])
    kernel = functools.partial(spnn_kernel, acts=acts, d=d,
                               h_sizes=(h0, h1), b_offs=b_offs)

    def const_spec(a):
        return pl.BlockSpec(a.shape, lambda i: (0, 0))

    # Advisory cost so XLA schedules the wrapper pad/transpose/slices sensibly.
    flops_per_col = 2 * (h0 * d + h1 * h0 + n_mid * h1
                         + 3 * (2 * dd) * (2 * d)      # expdiv2 / expmod2 (x2)
                         + (2 * d) * (2 * dd)          # merged M^T reductions
                         + nrow_out * ncol) + 12 * dd  # elementwise blends/products
    const_bytes = 4 * int(w0f.size + w1f.size + wbig.size + ball.size
                          + expall_j.size + rmod2_j.size + dmask_j.size + rout.size)
    cost = pl.CostEstimate(
        flops=int(flops_per_col) * int(Bp),
        transcendentals=int(h0 + h1) * int(Bp),
        bytes_accessed=int((d + nrow_out) * 4) * int(Bp) + const_bytes)

    grid = (Bp // batch_tile,)
    packed = pl.pallas_call(
        kernel,
        grid=grid,
        in_specs=[
            pl.BlockSpec((d, batch_tile), lambda i: (0, i)),             # x (lane-tiled)
            const_spec(w0f), const_spec(w1f), const_spec(wbig), const_spec(ball),
            const_spec(expall_j), const_spec(rmod2_j), const_spec(dmask_j),
            const_spec(rout),
        ],
        out_specs=pl.BlockSpec((nrow_out, batch_tile), lambda i: (0, i)),
        out_shape=jax.ShapeDtypeStruct((nrow_out, Bp), jnp.float32),
        compiler_params=pltpu.CompilerParams(dimension_semantics=("parallel",)),
        cost_estimate=cost,
    )(xT, w0f, w1f, wbig, ball, expall_j, rmod2_j, dmask_j, rout)

    # Cheap XLA-side split/transpose back to the PyTorch-facing (B, d) layout.
    x1 = packed[0 * d:1 * d, :B].T
    degE = packed[1 * d:2 * d, :B].T
    degS = packed[2 * d:3 * d, :B].T
    return x1, degE, degS


def spnn_ref(x, dt, params, activation):
    """Plain-JAX reference mirroring the PyTorch forward exactly."""
    w0, b0, w1, b1, w2, b2 = params
    B, d = x.shape
    h = _act(x @ w0.T + b0, activation)
    h = _act(h @ w1.T + b1, activation)
    out = h @ w2.T + b2
    nL = d * (d + 1) // 2 - d
    dEdz = out[:, :d][..., None]
    dSdz = out[:, d:2 * d][..., None]
    Lvec = out[:, 2 * d:2 * d + nL]
    Mvec = out[:, 2 * d + nL:]
    ri, ci = np.tril_indices(d, -1)
    L = jnp.zeros((B, d, d)).at[:, ri, ci].set(Lvec)
    L = L - jnp.swapaxes(L, 1, 2)
    ri2, ci2 = np.tril_indices(d, 0)
    M = jnp.zeros((B, d, d)).at[:, ri2, ci2].set(Mvec)
    eye = jnp.eye(d)
    M = M - M * eye + jnp.abs(M) * eye
    M = M @ jnp.swapaxes(M, 1, 2)
    dzdt = (L @ dEdz + M @ dSdz)[..., 0]
    degE = (M @ dEdz)[..., 0]
    degS = (L @ dSdz)[..., 0]
    return x + dt * dzdt, degE, degS


if __name__ == "__main__":
    d, B = DIM_IN, 256
    key = jax.random.PRNGKey(0)
    ks = jax.random.split(key, 8)

    # Deterministic parameter init; weights stored in PyTorch (out, in) layout.
    dims = [d] + HIDDEN + [DIM_OUT]
    params = []
    for li in range(3):
        fan_in, fan_out = dims[li], dims[li + 1]
        w = jax.random.normal(ks[li], (fan_out, fan_in), jnp.float32) / np.sqrt(fan_in)
        b = jax.random.normal(ks[li + 3], (fan_out,), jnp.float32) * 0.1
        params += [w, b]
    params = tuple(params)

    x = jax.random.normal(ks[6], (B, d), jnp.float32)
    dt = 0.01

    x1, degE, degS = spnn_forward(x, dt, params)
    jax.block_until_ready((x1, degE, degS))

    rx1, rdegE, rdegS = spnn_ref(x, dt, params, ACTIVATION)
    assert np.allclose(np.asarray(x1), np.asarray(rx1), atol=1e-4, rtol=1e-4)
    assert np.allclose(np.asarray(degE), np.asarray(rdegE), atol=1e-4, rtol=1e-4)
    assert np.allclose(np.asarray(degS), np.asarray(rdegS), atol=1e-4, rtol=1e-4)
    print("KERNEL_OK")
</pallas_src>

<mosaic_0001>
module attributes {stable_mosaic.version = 11 : i64} {
  func.func @spnn_kernel(%arg0: i32, %arg1: memref<4x128xf32, #tpu.memory_space<vmem>>, %arg2: memref<32x4xf32, #tpu.memory_space<vmem>>, %arg3: memref<32x32xf32, #tpu.memory_space<vmem>>, %arg4: memref<40x32xf32, #tpu.memory_space<vmem>>, %arg5: memref<104x1xf32, #tpu.memory_space<vmem>>, %arg6: memref<64x8xf32, #tpu.memory_space<vmem>>, %arg7: memref<8x32xf32, #tpu.memory_space<vmem>>, %arg8: memref<16x1xf32, #tpu.memory_space<vmem>>, %arg9: memref<16x56xf32, #tpu.memory_space<vmem>>, %arg10: memref<16x128xf32, #tpu.memory_space<vmem>>) attributes {dimension_semantics = [#tpu.dimension_semantics<parallel>], iteration_bounds = array<i64: 2>, scalar_prefetch = 0 : i64, scratch_operands = 0 : i64, tpu.core_type = #tpu.core_type<tc>, window_params = [{transform_indices = @transform_0, window_bounds = array<i64: 4, 128>}, {pipeline_mode = #tpu.pipeline_mode<synchronous>, transform_indices = @transform_1, window_bounds = array<i64: 32, 4>}, {pipeline_mode = #tpu.pipeline_mode<synchronous>, transform_indices = @transform_2, window_bounds = array<i64: 32, 32>}, {pipeline_mode = #tpu.pipeline_mode<synchronous>, transform_indices = @transform_3, window_bounds = array<i64: 40, 32>}, {pipeline_mode = #tpu.pipeline_mode<synchronous>, transform_indices = @transform_4, window_bounds = array<i64: 104, 1>}, {pipeline_mode = #tpu.pipeline_mode<synchronous>, transform_indices = @transform_5, window_bounds = array<i64: 64, 8>}, {pipeline_mode = #tpu.pipeline_mode<synchronous>, transform_indices = @transform_6, window_bounds = array<i64: 8, 32>}, {pipeline_mode = #tpu.pipeline_mode<synchronous>, transform_indices = @transform_7, window_bounds = array<i64: 16, 1>}, {pipeline_mode = #tpu.pipeline_mode<synchronous>, transform_indices = @transform_8, window_bounds = array<i64: 16, 56>}, {transform_indices = @transform_9, window_bounds = array<i64: 16, 128>}]} {
    %c0 = arith.constant 0 : index
    %c0_0 = arith.constant 0 : index
    %0 = vector.load %arg1[%c0, %c0_0] : memref<4x128xf32, #tpu.memory_space<vmem>>, vector<4x128xf32>
    %c0_1 = arith.constant 0 : index
    %c0_2 = arith.constant 0 : index
    %1 = vector.load %arg5[%c0_1, %c0_2] : memref<104x1xf32, #tpu.memory_space<vmem>>, vector<32x1xf32>
    %c32 = arith.constant 32 : index
    %c0_3 = arith.constant 0 : index
    %2 = vector.load %arg5[%c32, %c0_3] : memref<104x1xf32, #tpu.memory_space<vmem>>, vector<32x1xf32>
    %c64 = arith.constant 64 : index
    %c0_4 = arith.constant 0 : index
    %3 = vector.load %arg5[%c64, %c0_4] : memref<104x1xf32, #tpu.memory_space<vmem>>, vector<40x1xf32>
    %c0_5 = arith.constant 0 : index
    %c0_6 = arith.constant 0 : index
    %4 = vector.load %arg2[%c0_5, %c0_6] : memref<32x4xf32, #tpu.memory_space<vmem>>, vector<32x4xf32>
    %cst = arith.constant dense<0.000000e+00> : vector<32x128xf32>
    %5 = tpu.matmul %4, %0, %cst {dimension_numbers = #tpu.dot_dimension_numbers<[1], [0], [0], [1], [0, 0, 1, 1], [], []>} : vector<32x4xf32>, vector<4x128xf32>, vector<32x128xf32> -> vector<32x128xf32>
    %6 = vector.broadcast %1 : vector<32x1xf32> to vector<32x128xf32>
    %7 = arith.addf %5, %6 : vector<32x128xf32>
    %8 = math.tanh %7 : vector<32x128xf32>
    %c0_7 = arith.constant 0 : index
    %c0_8 = arith.constant 0 : index
    %9 = vector.load %arg3[%c0_7, %c0_8] : memref<32x32xf32, #tpu.memory_space<vmem>>, vector<32x32xf32>
    %cst_9 = arith.constant dense<0.000000e+00> : vector<32x128xf32>
    %10 = tpu.matmul %9, %8, %cst_9 {dimension_numbers = #tpu.dot_dimension_numbers<[1], [0], [0], [1], [0, 0, 1, 1], [], []>} : vector<32x32xf32>, vector<32x128xf32>, vector<32x128xf32> -> vector<32x128xf32>
    %11 = vector.broadcast %2 : vector<32x1xf32> to vector<32x128xf32>
    %12 = arith.addf %10, %11 : vector<32x128xf32>
    %13 = math.tanh %12 : vector<32x128xf32>
    %c0_10 = arith.constant 0 : index
    %c0_11 = arith.constant 0 : index
    %14 = vector.load %arg4[%c0_10, %c0_11] : memref<40x32xf32, #tpu.memory_space<vmem>>, vector<40x32xf32>
    %cst_12 = arith.constant dense<0.000000e+00> : vector<40x128xf32>
    %15 = tpu.matmul %14, %13, %cst_12 {dimension_numbers = #tpu.dot_dimension_numbers<[1], [0], [0], [1], [0, 0, 1, 1], [], []>} : vector<40x32xf32>, vector<32x128xf32>, vector<40x128xf32> -> vector<40x128xf32>
    %16 = vector.broadcast %3 : vector<40x1xf32> to vector<40x128xf32>
    %17 = arith.addf %15, %16 : vector<40x128xf32>
    %18 = vector.extract_strided_slice %17 {offsets = [0, 0], sizes = [16, 128], strides = [1, 1]} : vector<40x128xf32> to vector<16x128xf32>
    %19 = vector.extract_strided_slice %17 {offsets = [16, 0], sizes = [16, 128], strides = [1, 1]} : vector<40x128xf32> to vector<16x128xf32>
    %20 = vector.extract_strided_slice %17 {offsets = [32, 0], sizes = [8, 128], strides = [1, 1]} : vector<40x128xf32> to vector<8x128xf32>
    %c0_13 = arith.constant 0 : index
    %c0_14 = arith.constant 0 : index
    %21 = vector.load %arg8[%c0_13, %c0_14] : memref<16x1xf32, #tpu.memory_space<vmem>>, vector<16x1xf32>
    %cst_15 = arith.constant 5.000000e-01 : f32
    %22 = vector.broadcast %cst_15 : f32 to vector<16x1xf32>
    %23 = arith.cmpf ogt, %21, %22 : vector<16x1xf32>
    %24 = math.absf %19 : vector<16x128xf32>
    %25 = vector.shape_cast %23 : vector<16x1xi1> to vector<16x1xi1>
    %26 = vector.broadcast %25 : vector<16x1xi1> to vector<16x128xi1>
    %27 = arith.select %26, %24, %19 : vector<16x128xi1>, vector<16x128xf32>
    %c0_16 = arith.constant 0 : index
    %c0_17 = arith.constant 0 : index
    %28 = vector.load %arg6[%c0_16, %c0_17] : memref<64x8xf32, #tpu.memory_space<vmem>>, vector<32x8xf32>
    %c32_18 = arith.constant 32 : index
    %c0_19 = arith.constant 0 : index
    %29 = vector.load %arg6[%c32_18, %c0_19] : memref<64x8xf32, #tpu.memory_space<vmem>>, vector<32x8xf32>
    %c0_20 = arith.constant 0 : index
    %c0_21 = arith.constant 0 : index
    %30 = vector.load %arg7[%c0_20, %c0_21] : memref<8x32xf32, #tpu.memory_space<vmem>>, vector<8x32xf32>
    %cst_22 = arith.constant dense<0.000000e+00> : vector<32x128xf32>
    %31 = tpu.matmul %29, %20, %cst_22 {dimension_numbers = #tpu.dot_dimension_numbers<[1], [0], [0], [1], [0, 0, 1, 1], [], []>} : vector<32x8xf32>, vector<8x128xf32>, vector<32x128xf32> -> vector<32x128xf32>
    %32 = tpu.concatenate %27, %27 in 0 : vector<16x128xf32>, vector<16x128xf32> -> vector<32x128xf32>
    %33 = arith.mulf %32, %31 : vector<32x128xf32>
    %cst_23 = arith.constant dense<0.000000e+00> : vector<8x128xf32>
    %34 = tpu.matmul %30, %33, %cst_23 {dimension_numbers = #tpu.dot_dimension_numbers<[1], [0], [0], [1], [0, 0, 1, 1], [], []>} : vector<8x32xf32>, vector<32x128xf32>, vector<8x128xf32> -> vector<8x128xf32>
    %cst_24 = arith.constant dense<0.000000e+00> : vector<32x128xf32>
    %35 = tpu.matmul %28, %20, %cst_24 {dimension_numbers = #tpu.dot_dimension_numbers<[1], [0], [0], [1], [0, 0, 1, 1], [], []>} : vector<32x8xf32>, vector<8x128xf32>, vector<32x128xf32> -> vector<32x128xf32>
    %cst_25 = arith.constant dense<0.000000e+00> : vector<32x128xf32>
    %36 = tpu.matmul %28, %34, %cst_25 {dimension_numbers = #tpu.dot_dimension_numbers<[1], [0], [0], [1], [0, 0, 1, 1], [], []>} : vector<32x8xf32>, vector<8x128xf32>, vector<32x128xf32> -> vector<32x128xf32>
    %37 = vector.extract_strided_slice %35 {offsets = [0, 0], sizes = [16, 128], strides = [1, 1]} : vector<32x128xf32> to vector<16x128xf32>
    %38 = arith.mulf %18, %37 : vector<16x128xf32>
    %39 = vector.extract_strided_slice %36 {offsets = [0, 0], sizes = [16, 128], strides = [1, 1]} : vector<32x128xf32> to vector<16x128xf32>
    %40 = arith.mulf %27, %39 : vector<16x128xf32>
    %41 = arith.addf %38, %40 : vector<16x128xf32>
    %42 = vector.extract_strided_slice %36 {offsets = [16, 0], sizes = [16, 128], strides = [1, 1]} : vector<32x128xf32> to vector<16x128xf32>
    %43 = arith.mulf %27, %42 : vector<16x128xf32>
    %44 = vector.extract_strided_slice %35 {offsets = [16, 0], sizes = [16, 128], strides = [1, 1]} : vector<32x128xf32> to vector<16x128xf32>
    %45 = arith.mulf %18, %44 : vector<16x128xf32>
    %46 = tpu.concatenate %41, %43, %45, %0, %0 in 0 : vector<16x128xf32>, vector<16x128xf32>, vector<16x128xf32>, vector<4x128xf32>, vector<4x128xf32> -> vector<56x128xf32>
    %c0_26 = arith.constant 0 : index
    %c0_27 = arith.constant 0 : index
    %47 = vector.load %arg9[%c0_26, %c0_27] : memref<16x56xf32, #tpu.memory_space<vmem>>, vector<16x56xf32>
    %cst_28 = arith.constant dense<0.000000e+00> : vector<16x128xf32>
    %48 = tpu.matmul %47, %46, %cst_28 {dimension_numbers = #tpu.dot_dimension_numbers<[1], [0], [0], [1], [0, 0, 1, 1], [], []>} : vector<16x56xf32>, vector<56x128xf32>, vector<16x128xf32> -> vector<16x128xf32>
    %c0_29 = arith.constant 0 : index
    %c0_30 = arith.constant 0 : index
    %49 = vector.load %arg10[%c0_29, %c0_30] : memref<16x128xf32, #tpu.memory_space<vmem>>, vector<16x128xf32>
    tpu.vector_store %arg10[%c0_29, %c0_30], %48 {strides = array<i32>} : memref<16x128xf32, #tpu.memory_space<vmem>>, vector<16x128xf32>,
    return
  }
  func.func @transform_0(%arg0: i32) -> (i32, i32) {
    %c0_i32 = arith.constant 0 : i32
    %c0_i32_0 = arith.constant 0 : i32
    return %c0_i32, %arg0 : i32, i32
  }
  func.func @transform_1(%arg0: i32) -> (i32, i32) {
    %c0_i32 = arith.constant 0 : i32
    %c0_i32_0 = arith.constant 0 : i32
    %c0_i32_1 = arith.constant 0 : i32
    return %c0_i32, %c0_i32_0 : i32, i32
  }
  func.func @transform_2(%arg0: i32) -> (i32, i32) {
    %c0_i32 = arith.constant 0 : i32
    %c0_i32_0 = arith.constant 0 : i32
    %c0_i32_1 = arith.constant 0 : i32
    return %c0_i32, %c0_i32_0 : i32, i32
  }
  func.func @transform_3(%arg0: i32) -> (i32, i32) {
    %c0_i32 = arith.constant 0 : i32
    %c0_i32_0 = arith.constant 0 : i32
    %c0_i32_1 = arith.constant 0 : i32
    return %c0_i32, %c0_i32_0 : i32, i32
  }
  func.func @transform_4(%arg0: i32) -> (i32, i32) {
    %c0_i32 = arith.constant 0 : i32
    %c0_i32_0 = arith.constant 0 : i32
    %c0_i32_1 = arith.constant 0 : i32
    return %c0_i32, %c0_i32_0 : i32, i32
  }
  func.func @transform_5(%arg0: i32) -> (i32, i32) {
    %c0_i32 = arith.constant 0 : i32
    %c0_i32_0 = arith.constant 0 : i32
    %c0_i32_1 = arith.constant 0 : i32
    return %c0_i32, %c0_i32_0 : i32, i32
  }
  func.func @transform_6(%arg0: i32) -> (i32, i32) {
    %c0_i32 = arith.constant 0 : i32
    %c0_i32_0 = arith.constant 0 : i32
    %c0_i32_1 = arith.constant 0 : i32
    return %c0_i32, %c0_i32_0 : i32, i32
  }
  func.func @transform_7(%arg0: i32) -> (i32, i32) {
    %c0_i32 = arith.constant 0 : i32
    %c0_i32_0 = arith.constant 0 : i32
    %c0_i32_1 = arith.constant 0 : i32
    return %c0_i32, %c0_i32_0 : i32, i32
  }
  func.func @transform_8(%arg0: i32) -> (i32, i32) {
    %c0_i32 = arith.constant 0 : i32
    %c0_i32_0 = arith.constant 0 : i32
    %c0_i32_1 = arith.constant 0 : i32
    return %c0_i32, %c0_i32_0 : i32, i32
  }
  func.func @transform_9(%arg0: i32) -> (i32, i32) {
    %c0_i32 = arith.constant 0 : i32
    %c0_i32_0 = arith.constant 0 : i32
    return %c0_i32, %arg0 : i32, i32
  }
}

</mosaic_0001>

<bundles_post_ra>
// kernel: tpu_custom_call.1
= control target key start
LH: loop header
LB: loop body
LE: loop exit
PB: predicated region body
PF: predicated region fallthrough
CT: control target
= control target key end

     0   :  { %14 = vsyncpa [#allocation3], 0  ;;  %s1963_s0 = inlined_call_operand.vmem [shape: f32[4,256], index: 0, kind: input, shape index: {}]   ;;  %s1964_s1 = inlined_call_operand.vmem [shape: f32[32,4], index: 1, kind: input, shape index: {}]   ;;  %s1965_s2 = inlined_call_operand.vmem [shape: f32[32,32], index: 2, kind: input, shape index: {}]   ;;  %s1966_s3 = inlined_call_operand.vmem [shape: f32[40,32], index: 3, kind: input, shape index: {}]   ;;  %s1967_s4 = inlined_call_operand.vmem [shape: f32[104,1], index: 4, kind: input, shape index: {}]   ;;  %s1968_s5 = inlined_call_operand.vmem [shape: f32[64,8], index: 5, kind: input, shape index: {}]   ;;  %s1969_s6 = inlined_call_operand.vmem [shape: f32[8,32], index: 6, kind: input, shape index: {}]   ;;  %s1970_s7 = inlined_call_operand.vmem [shape: f32[16,1], index: 7, kind: input, shape index: {}]   ;;  %s1971_s8 = inlined_call_operand.vmem [shape: f32[16,56], index: 8, kind: input, shape index: {}]   ;;  %s1972_s9 = inlined_call_operand.hbm [shape: f32[16,256], index: 9, kind: output, shape index: {}]  }
   0x1   :  { %16 = vsyncpa [#allocation3 + $0x1], 0  ;;  %s1696_s30 = smov 0   ;;  %s1698_s10 = smov 0  }
   0x2   :  { %s1700_s11 = smov 0   ;;  %s1702_s12 = smov 0  }
   0x3 LB: > { %s1717_s13 = sadd.s32 4294967295, %s1636_s12   ;;  %s1291_s14 = sadd.s32 4294967294, %s1636_s12   ;;  %s1636_s12 = sphi %s1702_s12, %s1978_s12   ;;  %s1632_s11 = sphi %s1700_s11, %s1977_s11   ;;  %s1628_s10 = sphi %s1698_s10, %s1976_s10   ;;  %s1624_s30 = sphi %s1696_s30, %s1975_s30  }
   0x4   : > { %s1721_s15 = sadd.s32 1, %s1636_s12   ;;  %s223_s16 = sadd.s32 1, %s1632_s11 }
   0x5   : > { %s220_s17 = ssub.s32 %s1636_s12, %s1721_s15  ;;  %p233_p0 = scmp.ne.s32.totalorder %s1632_s11, %s1628_s10 }
   0x6   : > { %p221_p1 = scmp.eq.s32.totalorder %s220_s17, 0  ;;  %p234_p2 = scmp.eq.s32.totalorder %s1717_s13, 1 }
   0x7   : > { %p239_p3 = scmp.ne.s32.totalorder %s1628_s10, %s1624_s30  ;;  %p240_p4 = scmp.eq.s32.totalorder %s1291_s14, 1 }
   0x8   : > { %s1732_s18 = scalar_select %p221_p1, %s1632_s11, %s223_s16  }
   0x9   : > { %p1734_p5 = por %p234_p2, %p233_p0  ;;  %p1738_p6 = por %p240_p4, %p239_p3 }
   0xa   : > { %p1294_p7 = scmp.ge.s32.totalorder %s1636_s12, 1  ;;  %p289_p8 = scmp.lt.s32.totalorder %s1636_s12, 3 }
   0xc   : > { %p290_p9 = pnand %p1294_p7, %p289_p8 }
   0xd   : > { %p324_p10 = scmp.lt.s32.totalorder (!%p290_p9), %s1717_s13, 1  ;;  %v342_v0 = vld [vmem:[%s1964_s1] sm:$0xff] (!%p290_p9)  ;;  %vm366_vm0 = vcmask (!%p290_p9), 31744   ;;  %v1638_v2 = vmov (!%p290_p9), 0   ;;  %v331_v3 = vld [vmem:[%s1967_s4 + $0x10] sm:$0xff] (!%p290_p9)  ;;  %vm379_vm1 = vcmask (!%p290_p9), 1043456  }
   0xe   : > { %293 = sbr.rel (%p290_p9) target bundleno = 1631 (0x65f), region = 56  ;;  %1383 = vmatprep.mubr.msk.f32.mxu0 (!%p290_p9), %vm366_vm0, %v342_v0  ;;  %v329_v1 = vld [vmem:[%s1967_s4] sm:$0xff] (!%p290_p9)  ;;  %1556 = vset.pattern.permute.xlu0 (!%p290_p9), %v1638_v2  ;;  %v330_v4 = vld [vmem:[%s1967_s4 + $0x8] sm:$0xff] (!%p290_p9)  ;;  %v332_v5 = vld [vmem:[%s1967_s4 + $0x18] sm:$0xff] (!%p290_p9)  ;;  %vm496_vm4 = vcmask (!%p290_p9), 261120   ;;  %v1639_v45 = vmov (!%p290_p9), 0.0|0.0  }
   0xf   : > { %1557 = vset.pattern.permute.xlu1 (!%p290_p9), %v1638_v2  ;;  %348 = vperm.xlu0 (!%p290_p9), %1556, %v329_v1   ;;  %v343_v7 = vld [vmem:[%s1964_s1 + $0x8] sm:$0xff] (!%p290_p9)  ;;  %v344_v8 = vld [vmem:[%s1964_s1 + $0x10] sm:$0xff] (!%p290_p9)  ;;  %v333_v9 = vld [vmem:[%s1967_s4 + $0x20] sm:$0xff] (!%p290_p9)  ;;  %vm1640_vm5 = vmmov (!%p290_p9), 0   ;;  %v1641_v46 = vmov (!%p290_p9), 0.0   ;;  %vm760_vm6 = vcmask (!%p290_p9), 64512  }
  0x10   : > { %358 = vperm.xlu1 (!%p290_p9), %1557, %v331_v3   ;;  %v334_v10 = vld [vmem:[%s1967_s4 + $0x28] sm:$0xff] (!%p290_p9)  ;;  %v345_v11 = vld [vmem:[%s1964_s1 + $0x18] sm:$0xff] (!%p290_p9)  ;;  %v335_v12 = vld [vmem:[%s1967_s4 + $0x30] sm:$0xff] (!%p290_p9)  ;;  %vm1132_vm9 = vcmask (!%p290_p9), 457728   ;;  %s321_s17 = sand.u32 (!%p290_p9), 1, %s1628_s10   ;;  %s1327_s24 = sshll.u32 (!%p290_p9), %s1717_s13, 7 }
  0x11   : > { %v336_v13 = vld [vmem:[%s1967_s4 + $0x38] sm:$0xff] (!%p290_p9)  ;;  %v733_v14 = vld [vmem:[%s1970_s7] sm:$0xff] (!%p290_p9)  ;;  %v339_v16 = vld [vmem:[%s1967_s4 + $0x50] sm:$0xff] (!%p290_p9)  ;;  %s1920_s27 = scalar_lea.hbm (!%p290_p9), %s1972_s9, %s1327_s24 }
  0x12   : > { %v341_v15 = vld [vmem:[%s1967_s4 + $0x60] sm:$0xff] (!%p290_p9)  ;;  %v734_v17 = vld [vmem:[%s1970_s7 + $0x8] sm:$0xff] (!%p290_p9)  ;;  %vm735_vm2 = vcmp.gt.f32.partialorder (!%p290_p9), %v733_v14, 0.5  ;;  %v340_v18 = vld [vmem:[%s1967_s4 + $0x58] sm:$0xff] (!%p290_p9) }
  0x13   : > { %353 = vperm.xlu0 (!%p290_p9), %1556, %v330_v4   ;;  %vm736_vm3 = vcmp.gt.f32.partialorder (!%p290_p9), %v734_v17, 0.5  ;;  %v739_v19 = vsel (!%p290_p9), %vm735_vm2, 1, %v1638_v2  ;;  %v337_v21 = vld [vmem:[%s1967_s4 + $0x40] sm:$0xff] (!%p290_p9)  ;;  %v338_v22 = vld [vmem:[%s1967_s4 + $0x48] sm:$0xff] (!%p290_p9)  ;;  %v474_v43 = vld [vmem:[%s1965_s2 + $0x10] sm:$0xff] (!%p290_p9) }
  0x14   : > { %363 = vperm.xlu1 (!%p290_p9), %1557, %v332_v5   ;;  %v740_v20 = vsel (!%p290_p9), %vm736_vm3, 1, %v1638_v2  ;;  %v472_v23 = vld [vmem:[%s1965_s2] sm:$0xff] (!%p290_p9)  ;;  %v473_v42 = vld [vmem:[%s1965_s2 + $0x8] sm:$0xff] (!%p290_p9)  ;;  %v475_v44 = vld [vmem:[%s1965_s2 + $0x18] sm:$0xff] (!%p290_p9) }
  0x15   : > { %s325_s25 = scalar_select %p324_p10, %s1717_s13, 1  ;;  %1397 = vmatprep.mubr.msk.f32.mxu1 %vm496_vm4, %v472_v23  ;;  %v598_v1 = vld [vmem:[%s1966_s3] sm:$0xff]  ;;  %v599_v2 = vld [vmem:[%s1966_s3 + $0x8] sm:$0xff]  ;;  %v600_v3 = vld [vmem:[%s1966_s3 + $0x10] sm:$0xff] }
  0x16   : > { %v601_v4 = vld [vmem:[%s1966_s3 + $0x18] sm:$0xff]  ;;  %v602_v5 = vld [vmem:[%s1966_s3 + $0x20] sm:$0xff]  ;;  %s1642_s13 = smov [#allocation2]  }
  0x17   : > { %s1296_s28 = sshll.u32 %s325_s25, 2  ;;  %478 = vperm.xlu0 %1556, %v333_v9   ;;  %v751_v23 = vld [vmem:[%s1968_s5] sm:$0xff]  ;;  %s1578_s14 = sshll.u32 %s1642_s13, 4  ;;  %s1579_s14 = int_to_ptr.vmem [resolvable:$false] %s1578_s14 }
  0x18   : > { %s327_s21 = scalar_lea.vmem %s1963_s0, %s1296_s28  ;;  %483 = vperm.xlu1 %1557, %v334_v10   ;;  %s1922_s28 = scalar_lea.sflag [#allocation3], %s321_s17 }
  0x19   : > { %v1765_v6 = vld [vmem:[%s327_s21] sm:$0xf]  ;;  %s1295_s21 = sshll.u32 %s321_s17, 4  ;;  %s1580_s16 = scalar_lea.vmem %s1579_s14, 512 }
  0x1a   : > { %1381 = vmatprep.subr.msk.mxu0 %vm379_vm1, %v1765_v6  ;;  %s323_s22 = scalar_lea.vmem [#allocation2], %s1295_s21 }
  0x1b   : > { %1382 = vmatpush3.msk.msra.mxu0 %vm379_vm1, %v1765_v6  ;;  %488 = vperm.xlu0 %1556, %v335_v12   ;;  %s1229_s23 = sshll.u32 %s323_s22, 4  ;;  %s1915_s23 = int_to_ptr.vmem [resolvable:$true] %s1229_s23 }
  0x1c   : > { %1384 = vmatmul.mubr.msk.f32.vlgmr.msra.gmra.mrb[0].mxu0 %vm366_vm0, %v343_v7  ;;  %493 = vperm.xlu1 %1557, %v336_v13   ;;  %v755_v7 = vld [vmem:[%s1968_s5 + $0x20] sm:$0xff]  ;;  %s1574_s29 = scalar_lea.vmem %s1915_s23, 256  ;;  %p1581_p0 = scmp.lt.s32.totalorder %s1915_s23, %s1579_s14 }
  0x1d   : > { %1386 = vmatprep.mubr.msk.f32.mxu0 %vm366_vm0, %v344_v8  ;;  %1486 = vmatprep.subr.bf16.mxu0 %v1639_v45  ;;  %p1575_p11 = scmp.ne.s32.totalorder %s1915_s23, %s1574_s29  ;;  %p1582_p1 = scmp.lt.s32.totalorder %s1580_s16, %s1574_s29 }
  0x1f   : > { %625 = vperm.xlu0 %1556, %v341_v15   ;;  %p1576_p12 = pnand %p1575_p11, %p1734_p5  ;;  %p1583_p2 = por %p1582_p1, %p1581_p0 }
  0x20   : > { %1387 = vmatmul.mubr.msk.f32.gmra.mrb[2].mxu0 %vm366_vm0, %v345_v11  ;;  %615 = vperm.xlu1 %1557, %v339_v16  }
  0x21   : > { %1411 = vmatprep.mubr.msk.f32.mxu0 %vm1640_vm5, %v1641_v46  ;;  %p1577_p13 = pneg %p1576_p12 }
  0x23   : > { %620 = vperm.xlu0 %1556, %v340_v18   ;;  %p1584_p3 = pnand %p1583_p2, %p1577_p13 }
  0x24   : > { %742 = vperm.xlu1 %1557, %v739_v19  }
  0x27   : > { %745 = vperm.xlu0 %1556, %v740_v20   ;;  %v756_v20 = vld [vmem:[%s1968_s5 + $0x28] sm:$0xff] }
  0x28   : > { %605 = vperm.xlu1 %1557, %v337_v21   ;;  %v757_v21 = vld [vmem:[%s1968_s5 + $0x30] sm:$0xff] }
  0x2b   : > { %610 = vperm.xlu0 %1556, %v338_v22   ;;  %v758_v22 = vld [vmem:[%s1968_s5 + $0x38] sm:$0xff] }
  0x8e   : > { %v349_v24 = vpop.permute.xlu0 %348 }
  0x8f   : > { %v359_v25 = vpop.permute.xlu1 %358 }
  0x92   : > { %v354_v26 = vpop.permute.xlu0 %353 }
  0x93   : > { %v364_v31 = vpop.permute.xlu1 %363 }
  0x96   : > { %v479_v48 = vpop.permute.xlu0 %478 }
  0x97   : > { %v484_v47 = vpop.permute.xlu1 %483 }
  0x9a   : > { %v489_v55 = vpop.permute.xlu0 %488 }
  0x9b   : > { %v494_v53 = vpop.permute.xlu1 %493 }
  0x9e   : > { %v626_v16 = vpop.permute.xlu0 %625 }
  0xef   : > { %v1385_v27 = vpop.f32.mrb[0].mxu0 }
  0xf0   : > { %v455_v28 = vadd.f32 %v1385_v27, %v354_v26  ;;  %v449_v29 = vpop.f32.mrb[1].mxu0  ;;  %v754_v26 = vld [vmem:[%s1968_s5 + $0x18] sm:$0xff]  ;;  %v621_v27 = vpop.permute.xlu0 %620 }
  0xf1   : > { %v450_v30 = vadd.f32 %v449_v29, %v349_v24  ;;  %v752_v24 = vld [vmem:[%s1968_s5 + $0x8] sm:$0xff] }
  0xf2   : > { %1558 = vtanh.f32 %v455_v28  ;;  %v616_v28 = vpop.permute.xlu1 %615 }
  0xf3   : > { %1560 = vtanh.f32 %v450_v30  ;;  %v1388_v32 = vpop.f32.mrb[2].mxu0 }
  0xf4   : > { %v465_v33 = vadd.f32 %v1388_v32, %v364_v31  ;;  %v459_v34 = vpop.f32.mrb[3].mxu0 }
  0xf5   : > { %v460_v35 = vadd.f32 %v459_v34, %v359_v25  ;;  %v753_v25 = vld [vmem:[%s1968_s5 + $0x10] sm:$0xff] }
  0xf6   : > { %1562 = vtanh.f32 %v465_v33  ;;  %v746_v33 = vpop.permute.xlu0 %745  ;;  %v743_v34 = vpop.permute.xlu1 %742 }
  0xf7   : > { %1564 = vtanh.f32 %v460_v35  ;;  %vm748_vm7 = vcmp.eq.s32.totalorder %v746_v33, 1  ;;  %vm747_vm8 = vcmp.eq.s32.totalorder %v743_v34, 1 }
  0xfc   : > { %v1559_v36 = vpop.eup %1558 }
  0xfd   : > { %v1561_v37 = vpop.eup %1560 }
  0xfe   : > { %v1478_v38 = vpack.c.bf16 %v1559_v36, %v1561_v37 }
 0x100   : > { %v1563_v39 = vpop.eup %1562  ;;  %1479 = vmatprep.subr.bf16.mxu1 %v1478_v38 }
 0x101   : > { %v1565_v40 = vpop.eup %1564  ;;  %1481 = vmatpush3.bf16.msra.mxu1 %v1478_v38 }
 0x102   : > { %v1482_v41 = vpack.c.bf16 %v1563_v39, %v1565_v40 }
 0x104   : > { %1483 = vmatprep.subr.bf16.mxu1 %v1482_v41 }
 0x105   : > { %1485 = vmatpush3.bf16.msra.mxu1 %v1482_v41 }
 0x108   : > { %1398 = vmatmul.mubr.msk.f32.vlgmr.msra.gmra.mrb[0].mxu1 %vm496_vm4, %v473_v42 }
 0x109   : > { %1400 = vmatprep.mubr.msk.f32.mxu1 %vm496_vm4, %v474_v43 }
 0x10c   : > { %1401 = vmatmul.mubr.msk.f32.gmra.mrb[2].mxu1 %vm496_vm4, %v475_v44 }
 0x10d   : > { %1428 = vmatprep.mubr.msk.f32.mxu1 %vm760_vm6, %v755_v7 }
 0x1db   : > { %v1399_v49 = vpop.f32.mrb[0].mxu1 }
 0x1dc   : > { %v581_v50 = vadd.f32 %v1399_v49, %v484_v47  ;;  %v575_v51 = vpop.f32.mrb[1].mxu1 }
 0x1dd   : > { %v576_v52 = vadd.f32 %v575_v51, %v479_v48  ;;  %v606_v48 = vpop.permute.xlu1 %605 }
 0x1de   : > { %1566 = vtanh.f32 %v581_v50 }
 0x1df   : > { %1568 = vtanh.f32 %v576_v52  ;;  %v1402_v54 = vpop.f32.mrb[2].mxu1 }
 0x1e0   : > { %v591_v56 = vadd.f32 %v1402_v54, %v494_v53  ;;  %v585_v57 = vpop.f32.mrb[3].mxu1 }
 0x1e1   : > { %v586_v58 = vadd.f32 %v585_v57, %v489_v55 }
 0x1e2   : > { %1570 = vtanh.f32 %v591_v56  ;;  %v759_v56 = vld [vmem:[%s1969_s6] sm:$0xff] }
 0x1e3   : > { %1572 = vtanh.f32 %v586_v58 }
 0x1e8   : > { %v1567_v59 = vpop.eup %1566 }
 0x1e9   : > { %v1569_v60 = vpop.eup %1568 }
 0x1ea   : > { %v1487_v61 = vpack.c.bf16 %v1567_v59, %v1569_v60 }
 0x1ec   : > { %v1571_v62 = vpop.eup %1570  ;;  %1488 = vmatpush3.bf16.msra.mxu0 %v1487_v61 }
 0x1ed   : > { %v1573_v63 = vpop.eup %1572  ;;  %1489 = vmatprep.subr.bf16.mxu0 %v1639_v45 }
 0x1ee   : > { %v1490_v0 = vpack.c.bf16 %v1571_v62, %v1573_v63  ;;  %v1130_v63 = vld [vmem:[%s1971_s8] sm:$0xff] }
 0x1f0   : > { %1491 = vmatpush3.bf16.msra.mxu0 %v1490_v0 }
 0x1f1   : > { %1492 = vmatprep.subr.bf16.mxu0 %v1639_v45 }
 0x1f3   : > { %1412 = vmatmul.mubr.msk.f32.vlgmr.msra.gmra.mrb[4].mxu0 %vm496_vm4, %v598_v1 }
 0x1f4   : > { %1414 = vmatprep.mubr.msk.f32.mxu0 %vm1640_vm5, %v1641_v46 }
 0x1f7   : > { %1415 = vmatmul.mubr.msk.f32.gmra.mrb[6].mxu0 %vm496_vm4, %v599_v2 }
 0x1f8   : > { %1417 = vmatprep.mubr.msk.f32.mxu0 %vm1640_vm5, %v1641_v46 }
 0x1fb   : > { %1418 = vmatmul.mubr.msk.f32.gmra.mrb[8].mxu0 %vm496_vm4, %v600_v3 }
 0x1fc   : > { %1420 = vmatprep.mubr.msk.f32.mxu0 %vm1640_vm5, %v1641_v46 }
 0x1ff   : > { %1421 = vmatmul.mubr.msk.f32.gmra.mrb[10].mxu0 %vm496_vm4, %v601_v4 }
 0x200   : > { %1423 = vmatprep.mubr.msk.f32.mxu0 %vm1640_vm5, %v1641_v46 }
 0x203   : > { %1424 = vmatmul.mubr.msk.f32.gmra.mrb[12].mxu0 %vm496_vm4, %v602_v5 }
 0x204   : > { %1442 = vmatprep.mubr.msk.f32.mxu0 %vm1640_vm5, %v1641_v46  ;;  %v611_v46 = vpop.permute.xlu0 %610 }
 0x2c6   : > { %v709_v8 = vpop.f32.mrb[4].mxu0 }
 0x2c7   : > { %v1413_v9 = vpop.f32.mrb[5].mxu0  ;;  %v710_v50 = vadd.f32 %v709_v8, %v606_v48 }
 0x2ca   : > { %v714_v10 = vpop.f32.mrb[6].mxu0 }
 0x2cb   : > { %v1416_v11 = vpop.f32.mrb[7].mxu0  ;;  %v715_v49 = vadd.f32 %v714_v10, %v611_v46 }
 0x2ce   : > { %v719_v12 = vpop.f32.mrb[8].mxu0 }
 0x2cf   : > { %v1419_v13 = vpop.f32.mrb[9].mxu0  ;;  %v720_v30 = vadd.f32 %v719_v12, %v616_v28 }
 0x2d0   : > { %v1127_v13 = vrot.slane %v1765_v6, 4 }
 0x2d1   : > { %v737_v32 = vand.u32 2147483647, %v720_v30 }
 0x2d2   : > { %v724_v14 = vpop.f32.mrb[10].mxu0 }
 0x2d3   : > { %v1422_v15 = vpop.f32.mrb[11].mxu0  ;;  %v725_v29 = vadd.f32 %v724_v14, %v621_v27  ;;  %v749_v38 = vsel %vm747_vm8, %v737_v32, %v720_v30  ;;  %v1129_v14 = vsel %vm379_vm1, %v1765_v6, %v1127_v13 }
 0x2d4   : > { %v1131_v15 = vld [vmem:[%s1971_s8 + $0x8] sm:$0xff] }
 0x2d5   : > { %v738_v31 = vand.u32 2147483647, %v725_v29 }
 0x2d6   : > { %v729_v17 = vpop.f32.mrb[12].mxu0 }
 0x2d7   : > { %v730_v18 = vadd.f32 %v729_v17, %v626_v16  ;;  %v1425_v19 = vpop.f32.mrb[13].mxu0  ;;  %v750_v35 = vsel %vm748_vm7, %v738_v31, %v725_v29 }
 0x2d9   : > { %1426 = vmatprep.subr.mxu1 %v730_v18 }
 0x2da   : > { %1427 = vmatpush3.msra.mxu1 %v730_v18 }
 0x2db   : > { %1429 = vmatmul.mubr.msk.f32.vlgmr.msra.gmra.mrb[4].mxu1 %vm760_vm6, %v756_v20  ;;  %1445 = vmatprep.subr.mxu1 %v730_v18 }
 0x2dc   : > { %1446 = vmatpush3.msra.mxu1 %v730_v18  ;;  %1431 = vmatprep.mubr.msk.f32.mxu1 %vm760_vm6, %v757_v21 }
 0x2df   : > { %1432 = vmatmul.mubr.msk.f32.gmra.mrb[6].mxu1 %vm760_vm6, %v758_v22 }
 0x2e0   : > { %1447 = vmatprep.mubr.msk.f32.mxu1 %vm760_vm6, %v751_v23 }
 0x2e3   : > { %1448 = vmatmul.mubr.msk.f32.vlgmr.msra.gmra.mrb[8].mxu1 %vm760_vm6, %v752_v24 }
 0x2e4   : > { %1450 = vmatprep.mubr.msk.f32.mxu1 %vm760_vm6, %v753_v25 }
 0x2e7   : > { %1451 = vmatmul.mubr.msk.f32.gmra.mrb[10].mxu1 %vm760_vm6, %v754_v26 }
 0x2e8   : > { %1475 = vmatprep.mubr.msk.f32.mxu1 %vm1132_vm9, %v1130_v63 }
 0x3ae   : > { %v1430_v36 = vpop.f32.mrb[4].mxu1 }
 0x3af   : > { %v859_v37 = vmul.f32 %v1430_v36, %v750_v35  ;;  %v839_v39 = vpop.f32.mrb[5].mxu1 }
 0x3b0   : > { %v858_v40 = vmul.f32 %v839_v39, %v749_v38 }
 0x3b2   : > { %v1493_v41 = vpack.c.bf16 %v859_v37, %v858_v40  ;;  %v1433_v42 = vpop.f32.mrb[6].mxu1 }
 0x3b3   : > { %v861_v43 = vmul.f32 %v1433_v42, %v750_v35  ;;  %v849_v44 = vpop.f32.mrb[7].mxu1 }
 0x3b4   : > { %v860_v47 = vmul.f32 %v849_v44, %v749_v38  ;;  %1494 = vmatpush3.bf16.msra.mxu0 %v1493_v41 }
 0x3b5   : > { %1495 = vmatprep.subr.bf16.mxu0 %v1639_v45 }
 0x3b6   : > { %v1496_v51 = vpack.c.bf16 %v861_v43, %v860_v47  ;;  %v1449_v52 = vpop.f32.mrb[8].mxu1 }
 0x3b7   : > { %v1118_v53 = vmul.f32 %v1449_v52, %v715_v49  ;;  %v1013_v54 = vpop.f32.mrb[9].mxu1 }
 0x3b8   : > { %v1117_v55 = vmul.f32 %v1013_v54, %v710_v50  ;;  %1497 = vmatpush3.bf16.msra.mxu0 %v1496_v51 }
 0x3ba   : > { %v1452_v57 = vpop.f32.mrb[10].mxu1 }
 0x3bb   : > { %v1126_v58 = vmul.f32 %v1452_v57, %v715_v49  ;;  %1443 = vmatmul.mubr.msk.f32.vlgmr.msra.gmra.mrb[14].mxu0 %vm496_vm4, %v759_v56  ;;  %v1023_v59 = vpop.f32.mrb[11].mxu1 }
 0x3bc   : > { %v1125_v60 = vmul.f32 %v1023_v59, %v710_v50  ;;  %1455 = vmatprep.mubr.msk.f32.mxu0 %vm760_vm6, %v751_v23 }
 0x3be   : > { %v1506_v45 = vpack.c.bf16 %v1126_v58, %v1125_v60 }
 0x48e   : > { %v931_v61 = vpop.f32.mrb[14].mxu0 }
 0x48f   : > { %1453 = vmatprep.subr.mxu0 %v931_v61  ;;  %v1444_v62 = vpop.f32.mrb[15].mxu0 }
 0x490   : > { %1454 = vmatpush3.msra.mxu0 %v931_v61 }
 0x491   : > { %1456 = vmatmul.mubr.msk.f32.vlgmr.msra.gmra.mrb[16].mxu0 %vm760_vm6, %v752_v24 }
 0x492   : > { %1458 = vmatprep.mubr.msk.f32.mxu0 %vm760_vm6, %v753_v25 }
 0x495   : > { %1459 = vmatmul.mubr.msk.f32.gmra.mrb[18].mxu0 %vm760_vm6, %v754_v26 }
 0x564   : > { %v1457_v0 = vpop.f32.mrb[16].mxu0 }
 0x565   : > { %v1120_v1 = vmul.f32 %v1457_v0, %v750_v35  ;;  %v1098_v2 = vpop.f32.mrb[17].mxu0 }
 0x566   : > { %v1119_v3 = vmul.f32 %v1098_v2, %v749_v38 }
 0x567   : > { %v1122_v4 = vadd.f32 %v1120_v1, %v1118_v53 }
 0x568   : > { %v1121_v5 = vadd.f32 %v1119_v3, %v1117_v55  ;;  %v1460_v7 = vpop.f32.mrb[18].mxu0 }
 0x569   : > { %v1124_v8 = vmul.f32 %v1460_v7, %v750_v35  ;;  %v1108_v9 = vpop.f32.mrb[19].mxu0 }
 0x56a   : > { %v1123_v10 = vmul.f32 %v1108_v9, %v749_v38  ;;  %v1498_v11 = vpack.c.bf16 %v1122_v4, %v1121_v5 }
 0x56c   : > { %v1502_v12 = vpack.c.bf16 %v1124_v8, %v1123_v10  ;;  %1499 = vmatprep.subr.bf16.mxu1 %v1498_v11 }
 0x56d   : > { %1501 = vmatpush3.bf16.msra.mxu1 %v1498_v11 }
 0x56e   : > { %1503 = vmatprep.subr.bf16.mxu1 %v1502_v12 }
 0x571   : > { %1505 = vmatpush3.bf16.msra.mxu1 %v1502_v12 }
 0x572   : > { %1507 = vmatprep.subr.bf16.mxu1 %v1506_v45 }
 0x575   : > { %1509 = vmatpush3.bf16.msra.mxu1 %v1506_v45 }
 0x576   : > { %1473 = vmatprep.subr.mxu1 %v1129_v14 }
 0x579   : > { %1474 = vmatpush3.msra.mxu1 %v1129_v14 }
 0x57a   : > { %1476 = vmatmul.mubr.msk.f32.vlgmr.msra.gmra.mrb[12].mxu1 %vm1132_vm9, %v1131_v15 }
 0x64d   : > { %v1477_v6 = vpop.f32.mrb[12].mxu1 }
 0x64e   : > { %1215 = vst [vmem:[%s323_s22 + $0x8] sm:$0xff] %v1477_v6  ;;  %v1205_v16 = vpop.f32.mrb[13].mxu1 }
 0x64f   : > { %1214 = vst [vmem:[%s323_s22] sm:$0xff] %v1205_v16 }
 0x650   : > { %1587 = shalt.err (!%p1584_p3)
}
 0x651   : > { %s1588_s17 = scalar_lea.hbm %s1920_s27, 256  ;;  %s1592_s24 = scalar_lea.hbm %s1972_s9, 512 }
 0x652   : > { %p1589_p4 = scmp.ne.s32.totalorder %s1920_s27, %s1588_s17  ;;  %p1593_p9 = scmp.lt.u32.totalorder %s1920_s27, %s1972_s9 }
 0x653   : > { %p1594_p10 = scmp.lt.u32.totalorder %s1592_s24, %s1588_s17  ;;  %p1596_p12 = scmp.lt.u32.totalorder %s1588_s17, %s1920_s27 }
 0x654   : > { %p1590_p7 = pnand %p1589_p4, %p1734_p5 }
 0x655   : > { %p1595_p11 = por %p1594_p10, %p1593_p9 }
 0x656   : > { %p1591_p8 = pneg %p1590_p7 }
 0x657   : > { %p1597_p13 = por %p1596_p12, %p1595_p11 }
 0x659   : > { %p1598_p0 = pnand %p1597_p13, %p1591_p8 }
 0x65b   : > { %1601 = shalt.err (!%p1598_p0)
}
 0x65c   : > { %s1643_s29 = smov 128   ;;  %s1644_s13 = smov 256  }
 0x65d   : > { %s1645_s14 = smov 8  }
 0x65e   : > { %1510 = dma.vmem_to_hbm [thread:$0]  (%p1734_p5), %s1915_s23, 256, %s1920_s27, %s1922_s28, %s1643_s29, %s1644_s13, %s1645_s14  }
 0x65f PF: > { %p1516_p1 = scmp.ge.s32.totalorder %s1636_s12, 2  ;;  %s1244_s16 = sand.u32 1, %s1624_s30  }
 0x660   : > { %s1245_s17 = scalar_lea.sflag [#allocation3], %s1244_s16 }
 0x661   : > { %p1513_p2 = pnand %p1516_p1, %p1738_p6 }
 0x663   : > { %1619 = dma.done.wait (!%p1513_p2), %s1245_s17, 256  }
 0x664   : > { %1621 = vsyncadd (!%p1513_p2), %s1245_s17, 4294967040  ;;  %p19_p3 = scmp.ge.s32.totalorder %s1721_s15, 4   ;;  %s1975_s30 = smov %s1628_s10 }
 0x665   : > { %s1976_s10 = smov %s1632_s11  ;;  %s1977_s11 = smov %s1732_s18 }
 0x666   : > { %s1978_s12 = smov %s1721_s15  ;;  %21 = sbr.rel (!%p19_p3) target bundleno = 3 (0x3), region = 91 }
 0x66d   :  { %1250 = vsyncpa [#allocation3], 1 }
 0x66e   :  { %1252 = vsyncpa [#allocation3 + $0x1], 1 }

</bundles_post_ra>
